<compile_context>
chip_gen: v6e
topology: v6e:2x2x1
jax: 0.10.0
libtpu: 0.0.40
codegen_flags: <defaults>
</compile_context>

<pallas_src>
import math

import jax
import jax.numpy as jnp
from jax.experimental import pallas as pl
from jax.experimental.pallas import tpu as pltpu


def _round_up(x, m):
    return ((x + m - 1) // m) * m


def _tpu_generation():
    """Best-effort TPU generation detection ('v5' / 'v6' / 'v7') from the device kind."""
    try:
        kind = jax.devices()[0].device_kind.lower()
    except Exception:
        return None
    for g in ("v7", "v6", "v5"):
        if g in kind:
            return g
    return None


def _vmem_capacity_bytes(gen):
    try:
        cap = getattr(pltpu.get_tpu_info(), "vmem_capacity_bytes", None)
        if cap:
            return int(cap)
    except Exception:
        pass
    return (64 if gen == "v7" else 128) * 1024 * 1024


def _largest_divisor_chunk(total, multiple, cap):
    """Largest divisor of `total` that is a multiple of `multiple` and <= cap (None if none)."""
    c = (min(cap, total) // multiple) * multiple
    while c >= multiple:
        if total % c == 0:
            return c
        c -= multiple
    return None


def _select_tiles(M, embed_dim, mlp_dim, x_bytes, w_bytes, out_bytes,
                  tile_m, tile_h, gen, vmem_cap):
    budget = int(vmem_cap * 0.7)  # headroom for compiler-internal scratch / semaphores

    if tile_m is None:
        # Weight chunks are re-streamed once per row tile, so tile_m sets the
        # arithmetic intensity of the weight stream (~tile_m flop per bf16 byte).
        # HBM ridge points: v5e ~240, v7x ~310, v6e ~650 flop/B.
        target = {"v5": 256, "v6": 1024, "v7": 512}.get(gen, 512)
        tile_m = min(target, _round_up(M, 16))
        # v7x megacore: make sure both TensorCores get at least one row tile.
        if gen == "v7" and tile_m >= M and M >= 256:
            tile_m = _round_up((M + 1) // 2, 16)
    tile_m = max(16, _round_up(tile_m, 16))  # bf16 sublane packing -> multiple of 16

    if tile_h is None:
        tile_h = _largest_divisor_chunk(mlp_dim, 128, 512) or mlp_dim
    assert mlp_dim % tile_h == 0

    def footprint(tm, th):
        # double-buffered pipeline inputs/outputs + resident f32 accumulator
        return (2 * tm * embed_dim * x_bytes          # x tile
                + 2 * embed_dim * th * w_bytes        # w1 chunk
                + 2 * th * embed_dim * w_bytes        # w2 chunk
                + 2 * (th + embed_dim) * 4            # bias chunks (f32)
                + 2 * tm * embed_dim * out_bytes      # out tile
                + tm * embed_dim * 4)                 # acc scratch

    # Shrink until the working set fits: tile_h first (does not hurt the weight-stream
    # intensity), then tile_m.
    while footprint(tile_m, tile_h) > budget:
        smaller_h = (_largest_divisor_chunk(mlp_dim, 128, tile_h - 128)
                     if tile_h > 128 else None)
        if smaller_h is not None:
            tile_h = smaller_h
        elif tile_m > 64:
            tile_m = max(64, _round_up(tile_m // 2, 16))
        else:
            break

    vmem_limit = int(min(vmem_cap,
                         max(footprint(tile_m, tile_h) * 1.25, 16 * 1024 * 1024)))
    return tile_m, tile_h, vmem_limit


def _mlp_kernel(x_ref, w1_ref, b1_ref, w2_ref, b2_ref, o_ref, acc_ref):
    k = pl.program_id(1)

    @pl.when(k == 0)
    def _():
        acc_ref[...] = jnp.zeros_like(acc_ref)

    # fc1 over this mlp_dim chunk (MXU, f32 accumulation); bias + exact GELU in f32.
    x_t = x_ref[...].astype(w1_ref.dtype)   # per-tile cast -> no extra HBM pass on x
    h = jnp.dot(x_t, w1_ref[...], preferred_element_type=jnp.float32)
    h = h + b1_ref[...]
    h = 0.5 * h * (1.0 + jax.lax.erf(h * jnp.float32(1.0 / math.sqrt(2.0))))
    # TODO(synk): tanh-approx GELU would move this to the EUP slot (helps VALU-bound
    #             v5e configs), but exact erf matches torch.nn.functional.gelu default.

    # fc2 chunk, accumulated into the resident f32 scratch.
    acc_ref[...] += jnp.dot(h.astype(w2_ref.dtype), w2_ref[...],
                            preferred_element_type=jnp.float32)

    # TODO(synk): dropout is identity at inference; training-mode dropout would use
    #             pltpu.prng_seed + pltpu.prng_random_bits here.

    @pl.when(k == pl.num_programs(1) - 1)
    def _():
        o_ref[...] = (acc_ref[...] + b2_ref[...]).astype(o_ref.dtype)


def mlp_forward(x, w1, b1, w2, b2, *, tile_m=None, tile_h=None, matmul_dtype=None):
    """x: (..., embed_dim). Weights stored pre-transposed: w1 (embed, mlp), w2 (mlp, embed)."""
    embed_dim = x.shape[-1]
    mlp_dim = w1.shape[1]
    lead_shape = x.shape[:-1]

    # Default the MXU path to bf16 (f32 matmuls run at a fraction of the bf16 MXU rate
    # and double the weight-stream bytes).  Pass matmul_dtype=jnp.float32 for strict f32.
    if matmul_dtype is None:
        matmul_dtype = jnp.bfloat16 if w1.dtype == jnp.float32 else w1.dtype
    w1 = w1.astype(matmul_dtype)
    w2 = w2.astype(matmul_dtype)

    x2d = x.reshape(-1, embed_dim)          # keep original dtype; cast per-tile in-kernel
    M = x2d.shape[0]

    gen = _tpu_generation()
    vmem_cap = _vmem_capacity_bytes(gen)
    x_bytes = jnp.dtype(x2d.dtype).itemsize
    w_bytes = jnp.dtype(matmul_dtype).itemsize
    out_bytes = jnp.dtype(x.dtype).itemsize
    tile_m, tile_h, vmem_limit = _select_tiles(
        M, embed_dim, mlp_dim, x_bytes, w_bytes, out_bytes, tile_m, tile_h, gen, vmem_cap)

    M_pad = _round_up(M, tile_m)
    if M_pad != M:
        # TODO(synk): a masked store on the last row tile would avoid this extra pass over x.
        x2d = jnp.pad(x2d, ((0, M_pad - M), (0, 0)))

    grid = (M_pad // tile_m, mlp_dim // tile_h)
    n_row_tiles = grid[0]

    b1_2d = b1.reshape(1, mlp_dim).astype(jnp.float32)
    b2_2d = b2.reshape(1, embed_dim).astype(jnp.float32)

    cost = pl.CostEstimate(
        flops=4 * M_pad * embed_dim * mlp_dim,          # two matmuls, 2 flop/MAC
        transcendentals=M_pad * mlp_dim,                # erf per fc1 element
        bytes_accessed=int(
            M_pad * embed_dim * x_bytes
            + n_row_tiles * (w1.size + w2.size) * w_bytes   # weights re-streamed per row tile
            + n_row_tiles * (b1_2d.size + b2_2d.size) * 4
            + M_pad * embed_dim * out_bytes),
    )

    # TODO(synk): if xprof shows exposed DMA on the weight streams on v6e, add
    #             pipeline_mode=pl.Buffered(3) to the w1/w2 BlockSpecs (cheap on 128 MiB VMEM).
    out = pl.pallas_call(
        _mlp_kernel,
        out_shape=jax.ShapeDtypeStruct((M_pad, embed_dim), x.dtype),
        grid_spec=pltpu.PrefetchScalarGridSpec(
            num_scalar_prefetch=0,
            grid=grid,
            in_specs=[
                pl.BlockSpec((tile_m, embed_dim), lambda i, k: (i, 0)),   # x tile (resident over k)
                pl.BlockSpec((embed_dim, tile_h), lambda i, k: (0, k)),   # w1 chunk
                pl.BlockSpec((1, tile_h), lambda i, k: (0, k)),           # b1 chunk
                pl.BlockSpec((tile_h, embed_dim), lambda i, k: (k, 0)),   # w2 chunk
                pl.BlockSpec((1, embed_dim), lambda i, k: (0, 0)),        # b2
            ],
            out_specs=pl.BlockSpec((tile_m, embed_dim), lambda i, k: (i, 0)),
            scratch_shapes=[pltpu.VMEM((tile_m, embed_dim), jnp.float32)],
        ),
        compiler_params=pltpu.CompilerParams(
            dimension_semantics=("parallel", "arbitrary"),
            vmem_limit_bytes=vmem_limit,
        ),
        cost_estimate=cost,
    )(x2d, w1, b1_2d, w2, b2_2d)

    if M_pad != M:
        out = out[:M]
    return out.reshape(*lead_shape, embed_dim)


def init_params(key, embed_dim, mlp_dim):
    """Matches the PyTorch module's _init_weights:
       xavier_uniform_ on weights, normal(std=1e-6) on biases."""
    k1, k2, k3, k4 = jax.random.split(key, 4)
    bound1 = math.sqrt(6.0 / (embed_dim + mlp_dim))
    bound2 = math.sqrt(6.0 / (mlp_dim + embed_dim))
    # stored pre-transposed: (in, out)
    w1 = jax.random.uniform(k1, (embed_dim, mlp_dim), jnp.float32, -bound1, bound1)
    w2 = jax.random.uniform(k2, (mlp_dim, embed_dim), jnp.float32, -bound2, bound2)
    b1 = 1e-6 * jax.random.normal(k3, (mlp_dim,), jnp.float32)
    b2 = 1e-6 * jax.random.normal(k4, (embed_dim,), jnp.float32)
    return w1, b1, w2, b2


def _reference(x, w1, b1, w2, b2):
    embed_dim = x.shape[-1]
    h = x.reshape(-1, embed_dim) @ w1 + b1
    h = 0.5 * h * (1.0 + jax.lax.erf(h / jnp.sqrt(2.0)))
    return (h @ w2 + b2).reshape(*x.shape[:-1], w2.shape[1])


if __name__ == "__main__":
    key = jax.random.PRNGKey(0)

    # --- Test 1/2: small transformer-style Mlp shapes (batch, seq, embed_dim) ---
    batch, seq, embed_dim, mlp_dim = 2, 8, 32, 64
    kx, kp, kx2, kp2 = jax.random.split(key, 4)
    x = jax.random.normal(kx, (batch, seq, embed_dim), jnp.float32)
    w1, b1, w2, b2 = init_params(kp, embed_dim, mlp_dim)
    ref = _reference(x, w1, b1, w2, b2)

    # 1) strict f32 path — faithful to the torch module within fp tolerance.
    out_f32 = jax.block_until_ready(
        mlp_forward(x, w1, b1, w2, b2, matmul_dtype=jnp.float32))
    assert jnp.allclose(out_f32, ref, atol=1e-5, rtol=1e-5), "f32 mismatch vs reference"

    # 2) default bf16 MXU path (f32 accumulation; f32 bias/GELU) — looser tolerance.
    out_bf16 = jax.block_until_ready(mlp_forward(x, w1, b1, w2, b2))
    assert jnp.allclose(out_bf16, ref, atol=3e-2, rtol=3e-2), "bf16 mismatch vs reference"

    # --- Test 3: exercise row padding + mlp_dim chunk accumulation (grid > 1) ---
    batch2, seq2, embed2, mlp2 = 3, 50, 128, 256   # M = 150 (padded), 2 mlp chunks
    x2 = jax.random.normal(kx2, (batch2, seq2, embed2), jnp.float32)
    w1b, b1b, w2b, b2b = init_params(kp2, embed2, mlp2)
    ref2 = _reference(x2, w1b, b1b, w2b, b2b)
    out2 = jax.block_until_ready(
        mlp_forward(x2, w1b, b1b, w2b, b2b, tile_m=64, tile_h=128))
    assert jnp.allclose(out2, ref2, atol=5e-2, rtol=5e-2), "tiled bf16 mismatch vs reference"

    print("KERNEL_OK")
</pallas_src>

<mosaic_0001>
module attributes {stable_mosaic.version = 11 : i64} {
  func.func @_mlp_kernel(%arg0: i32, %arg1: i32, %arg2: memref<16x32xf32, #tpu.memory_space<vmem>>, %arg3: memref<32x64xf32, #tpu.memory_space<vmem>>, %arg4: memref<1x64xf32, #tpu.memory_space<vmem>>, %arg5: memref<64x32xf32, #tpu.memory_space<vmem>>, %arg6: memref<1x32xf32, #tpu.memory_space<vmem>>, %arg7: memref<16x32xf32, #tpu.memory_space<vmem>>, %arg8: memref<16x32xf32, #tpu.memory_space<vmem>>) attributes {dimension_semantics = [#tpu.dimension_semantics<parallel>, #tpu.dimension_semantics<arbitrary>], iteration_bounds = array<i64: 1, 1>, scalar_prefetch = 0 : i64, scratch_operands = 1 : i64, tpu.core_type = #tpu.core_type<tc>, window_params = [{transform_indices = @transform_0, window_bounds = array<i64: 16, 32>}, {transform_indices = @transform_1, window_bounds = array<i64: 32, 64>}, {transform_indices = @transform_2, window_bounds = array<i64: 1, 64>}, {transform_indices = @transform_3, window_bounds = array<i64: 64, 32>}, {pipeline_mode = #tpu.pipeline_mode<synchronous>, transform_indices = @transform_4, window_bounds = array<i64: 1, 32>}, {transform_indices = @transform_5, window_bounds = array<i64: 16, 32>}]} {
    %c0_i32 = arith.constant 0 : i32
    %0 = arith.cmpi eq, %arg1, %c0_i32 : i32
    %1 = arith.extui %0 : i1 to i32
    %c0_i32_0 = arith.constant 0 : i32
    %2 = arith.cmpi ne, %1, %c0_i32_0 : i32
    scf.if %2 {
      %cst_18 = arith.constant 0.000000e+00 : f32
      %25 = vector.broadcast %cst_18 : f32 to vector<16x32xf32>
      %c0_19 = arith.constant 0 : index
      %c0_20 = arith.constant 0 : index
      %26 = vector.load %arg8[%c0_19, %c0_20] : memref<16x32xf32, #tpu.memory_space<vmem>>, vector<16x32xf32>
      tpu.vector_store %arg8[%c0_19, %c0_20], %25 {strides = array<i32>} : memref<16x32xf32, #tpu.memory_space<vmem>>, vector<16x32xf32>,
    } else {
    }
    %c0 = arith.constant 0 : index
    %c0_1 = arith.constant 0 : index
    %3 = vector.load %arg2[%c0, %c0_1] : memref<16x32xf32, #tpu.memory_space<vmem>>, vector<16x32xf32>
    %c0_2 = arith.constant 0 : index
    %c0_3 = arith.constant 0 : index
    %4 = vector.load %arg3[%c0_2, %c0_3] : memref<32x64xf32, #tpu.memory_space<vmem>>, vector<32x64xf32>
    %cst = arith.constant dense<0.000000e+00> : vector<16x64xf32>
    %5 = tpu.matmul %3, %4, %cst {dimension_numbers = #tpu.dot_dimension_numbers<[1], [0], [0], [1], [0, 0, 1, 1], [], []>} : vector<16x32xf32>, vector<32x64xf32>, vector<16x64xf32> -> vector<16x64xf32>
    %c0_4 = arith.constant 0 : index
    %c0_5 = arith.constant 0 : index
    %6 = vector.load %arg4[%c0_4, %c0_5] : memref<1x64xf32, #tpu.memory_space<vmem>>, vector<1x64xf32>
    %7 = vector.broadcast %6 : vector<1x64xf32> to vector<16x64xf32>
    %8 = arith.addf %5, %7 : vector<16x64xf32>
    %cst_6 = arith.constant 5.000000e-01 : f32
    %9 = vector.broadcast %cst_6 : f32 to vector<16x64xf32>
    %10 = arith.mulf %9, %8 : vector<16x64xf32>
    %cst_7 = arith.constant 0.707106769 : f32
    %11 = vector.broadcast %cst_7 : f32 to vector<16x64xf32>
    %12 = arith.mulf %8, %11 : vector<16x64xf32>
    %13 = math.erf %12 : vector<16x64xf32>
    %cst_8 = arith.constant 1.000000e+00 : f32
    %14 = vector.broadcast %cst_8 : f32 to vector<16x64xf32>
    %15 = arith.addf %14, %13 : vector<16x64xf32>
    %16 = arith.mulf %10, %15 : vector<16x64xf32>
    %c0_9 = arith.constant 0 : index
    %c0_10 = arith.constant 0 : index
    %17 = vector.load %arg8[%c0_9, %c0_10] : memref<16x32xf32, #tpu.memory_space<vmem>>, vector<16x32xf32>
    %c0_11 = arith.constant 0 : index
    %c0_12 = arith.constant 0 : index
    %18 = vector.load %arg5[%c0_11, %c0_12] : memref<64x32xf32, #tpu.memory_space<vmem>>, vector<64x32xf32>
    %cst_13 = arith.constant dense<0.000000e+00> : vector<16x32xf32>
    %19 = tpu.matmul %16, %18, %cst_13 {dimension_numbers = #tpu.dot_dimension_numbers<[1], [0], [0], [1], [0, 0, 1, 1], [], []>} : vector<16x64xf32>, vector<64x32xf32>, vector<16x32xf32> -> vector<16x32xf32>
    %20 = arith.addf %17, %19 : vector<16x32xf32>
    %c0_14 = arith.constant 0 : index
    %c0_15 = arith.constant 0 : index
    %21 = vector.load %arg8[%c0_14, %c0_15] : memref<16x32xf32, #tpu.memory_space<vmem>>, vector<16x32xf32>
    tpu.vector_store %arg8[%c0_14, %c0_15], %20 {strides = array<i32>} : memref<16x32xf32, #tpu.memory_space<vmem>>, vector<16x32xf32>,
    %c0_i32_16 = arith.constant 0 : i32
    %22 = arith.cmpi eq, %arg1, %c0_i32_16 : i32
    %23 = arith.extui %22 : i1 to i32
    %c0_i32_17 = arith.constant 0 : i32
    %24 = arith.cmpi ne, %23, %c0_i32_17 : i32
    scf.if %24 {
      %c0_18 = arith.constant 0 : index
      %c0_19 = arith.constant 0 : index
      %25 = vector.load %arg8[%c0_18, %c0_19] : memref<16x32xf32, #tpu.memory_space<vmem>>, vector<16x32xf32>
      %c0_20 = arith.constant 0 : index
      %c0_21 = arith.constant 0 : index
      %26 = vector.load %arg6[%c0_20, %c0_21] : memref<1x32xf32, #tpu.memory_space<vmem>>, vector<1x32xf32>
      %27 = vector.broadcast %26 : vector<1x32xf32> to vector<16x32xf32>
      %28 = arith.addf %25, %27 : vector<16x32xf32>
      %c0_22 = arith.constant 0 : index
      %c0_23 = arith.constant 0 : index
      %29 = vector.load %arg7[%c0_22, %c0_23] : memref<16x32xf32, #tpu.memory_space<vmem>>, vector<16x32xf32>
      tpu.vector_store %arg7[%c0_22, %c0_23], %28 {strides = array<i32>} : memref<16x32xf32, #tpu.memory_space<vmem>>, vector<16x32xf32>,
    } else {
    }
    return
  }
  func.func @transform_0(%arg0: i32, %arg1: i32) -> (i32, i32) {
    %c0_i32 = arith.constant 0 : i32
    %c0_i32_0 = arith.constant 0 : i32
    return %arg0, %c0_i32 : i32, i32
  }
  func.func @transform_1(%arg0: i32, %arg1: i32) -> (i32, i32) {
    %c0_i32 = arith.constant 0 : i32
    %c0_i32_0 = arith.constant 0 : i32
    return %c0_i32, %arg1 : i32, i32
  }
  func.func @transform_2(%arg0: i32, %arg1: i32) -> (i32, i32) {
    %c0_i32 = arith.constant 0 : i32
    %c0_i32_0 = arith.constant 0 : i32
    return %c0_i32, %arg1 : i32, i32
  }
  func.func @transform_3(%arg0: i32, %arg1: i32) -> (i32, i32) {
    %c0_i32 = arith.constant 0 : i32
    %c0_i32_0 = arith.constant 0 : i32
    return %arg1, %c0_i32 : i32, i32
  }
  func.func @transform_4(%arg0: i32, %arg1: i32) -> (i32, i32) {
    %c0_i32 = arith.constant 0 : i32
    %c0_i32_0 = arith.constant 0 : i32
    %c0_i32_1 = arith.constant 0 : i32
    return %c0_i32, %c0_i32_0 : i32, i32
  }
  func.func @transform_5(%arg0: i32, %arg1: i32) -> (i32, i32) {
    %c0_i32 = arith.constant 0 : i32
    %c0_i32_0 = arith.constant 0 : i32
    return %arg0, %c0_i32 : i32, i32
  }
}

</mosaic_0001>

<bundles_post_ra>
// kernel: tpu_custom_call.1
= control target key start
LH: loop header
LB: loop body
LE: loop exit
PB: predicated region body
PF: predicated region fallthrough
CT: control target
= control target key end

     0   :  { %vm25_vm0 = vcmask 261120   ;;  %s436_s0 = inlined_call_operand.vmem [shape: f32[16,32], index: 0, kind: input, shape index: {}]   ;;  %s437_s1 = inlined_call_operand.vmem [shape: f32[32,64], index: 1, kind: input, shape index: {}]   ;;  %s438_s2 = inlined_call_operand.vmem [shape: f32[1,64], index: 2, kind: input, shape index: {}]   ;;  %s439_s3 = inlined_call_operand.vmem [shape: f32[64,32], index: 3, kind: input, shape index: {}]   ;;  %s440_s4 = inlined_call_operand.vmem [shape: f32[1,32], index: 4, kind: input, shape index: {}]   ;;  %s441_s5 = inlined_call_operand.hbm [shape: f32[16,32], index: 5, kind: output, shape index: {}]  }
   0x1   :  { %v33_v0 = vld [vmem:[%s437_s1 + $0x18] sm:$0xff]  ;;  %v32_v1 = vld [vmem:[%s437_s1 + $0x10] sm:$0xff]  ;;  %v28_v2 = vld [vmem:[%s436_s0] sm:$0xff] }
   0x2   :  { %283 = vmatprep.subr.mxu0 %v33_v0  ;;  %v31_v3 = vld [vmem:[%s437_s1 + $0x8] sm:$0xff]  ;;  %291 = vmatprep.mubr.msk.f32.mxu0 %vm25_vm0, %v28_v2 }
   0x3   :  { %284 = vmatpush3.msra.mxu0 %v33_v0 }
   0x4   :  { %10 = vsyncpa [#allocation4], 0  ;;  %285 = vmatprep.subr.mxu0 %v32_v1  ;;  %v30_v4 = vld [vmem:[%s437_s1] sm:$0xff]  ;;  %v29_v5 = vld [vmem:[%s436_s0 + $0x8] sm:$0xff]  ;;  %v343_v14 = vmov 0.0   ;;  %vm143_vm1 = vcmask 523264  }
   0x5   :  { %286 = vmatpush3.msra.mxu0 %v32_v1  ;;  %v142_v6 = vld [vmem:[%s439_s3 + $0x38] sm:$0xff]  ;;  %v141_v7 = vld [vmem:[%s439_s3 + $0x30] sm:$0xff]  ;;  %v140_v8 = vld [vmem:[%s439_s3 + $0x28] sm:$0xff]  ;;  %27 = vst.msk [vmem:[#allocation2 + $0x8] sm:$0xff] %vm25_vm0, %v343_v14  ;;  %s344_s21 = smov [#allocation3]  }
   0x6   :  { %287 = vmatprep.subr.mxu0 %v31_v3  ;;  %294 = vmatprep.subr.mxu1 %v142_v6  ;;  %v139_v9 = vld [vmem:[%s439_s3 + $0x20] sm:$0xff]  ;;  %v138_v10 = vld [vmem:[%s439_s3 + $0x18] sm:$0xff]  ;;  %v137_v11 = vld [vmem:[%s439_s3 + $0x10] sm:$0xff]  ;;  %26 = vst.msk [vmem:[#allocation2] sm:$0xff] %vm25_vm0, %v343_v14  ;;  %s250_s22 = sshll.u32 %s344_s21, 4  ;;  %s251_s22 = int_to_ptr.vmem [resolvable:$true] %s250_s22 }
   0x7   :  { %288 = vmatpush3.msra.mxu0 %v31_v3  ;;  %295 = vmatpush3.msra.mxu1 %v142_v6  ;;  %v136_v12 = vld [vmem:[%s439_s3 + $0x8] sm:$0xff]  ;;  %v135_v13 = vld [vmem:[%s439_s3] sm:$0xff]  ;;  %s321_s23 = scalar_lea.vmem %s251_s22, 256  ;;  %p326_p1 = scmp.lt.s32.totalorder %s251_s22, %s251_s22 }
   0x8   :  { %289 = vmatprep.subr.mxu0 %v30_v4  ;;  %296 = vmatprep.subr.mxu1 %v141_v7  ;;  %v261_v15 = vld [vmem:[%s438_s2] ss:$0 sm:$0xff]  ;;  %p322_p0 = scmp.ne.s32.totalorder %s251_s22, %s321_s23  ;;  %p327_p2 = scmp.lt.s32.totalorder %s321_s23, %s321_s23 }
   0x9   :  { %290 = vmatpush3.msra.mxu0 %v30_v4  ;;  %297 = vmatpush3.msra.mxu1 %v141_v7  ;;  %v266_v36 = vld [vmem:[%s440_s4] ss:$0 sm:$0xff] }
   0xa   :  { %292 = vmatmul.mubr.msk.f32.vlgmr.msra.gmra.mxu0 %vm25_vm0, %v29_v5  ;;  %298 = vmatprep.subr.mxu1 %v140_v8  ;;  %p328_p3 = por %p327_p2, %p326_p1 }
   0xb   :  { %299 = vmatpush3.msra.mxu1 %v140_v8 }
   0xc   :  { %300 = vmatprep.subr.mxu1 %v139_v9  ;;  %v134_v30 = vld [vmem:[#allocation2 + $0x8] sm:$0xff]  ;;  %p329_p4 = pnand %p328_p3, %p322_p0 }
   0xd   :  { %301 = vmatpush3.msra.mxu1 %v139_v9  ;;  %v133_v32 = vld [vmem:[#allocation2] sm:$0xff] }
   0xe   :  { %302 = vmatprep.subr.mxu1 %v138_v10 }
   0xf   :  { %303 = vmatpush3.msra.mxu1 %v138_v10 }
  0x10   :  { %304 = vmatprep.subr.mxu1 %v137_v11 }
  0x11   :  { %305 = vmatpush3.msra.mxu1 %v137_v11 }
  0x12   :  { %306 = vmatprep.subr.mxu1 %v136_v12 }
  0x13   :  { %307 = vmatpush3.msra.mxu1 %v136_v12 }
  0x14   :  { %308 = vmatprep.subr.mxu1 %v135_v13 }
  0x15   :  { %309 = vmatpush3.msra.mxu1 %v135_v13 }
  0xca   :  { %v293_v16 = vpop.f32.mrf.mxu0 }
  0xcb   :  { %v120_v17 = vadd.f32 %v293_v16, %v261_v15 }
  0xcc   :  { %v114_v18 = vpop.f32.mrf.mxu0 }
  0xcd   :  { %v126_v19 = vmul.f32 0.70710677, %v120_v17  ;;  %v115_v20 = vadd.f32 %v261_v15, %v114_v18  ;;  %v124_v27 = vmul.f32 0.5, %v120_v17 }
  0xcf   :  { %317 = verf.f32 %v126_v19  ;;  %v125_v21 = vmul.f32 0.70710677, %v115_v20  ;;  %v123_v25 = vmul.f32 0.5, %v115_v20 }
  0xd1   :  { %319 = verf.f32 %v125_v21 }
  0xdc   :  { %v318_v22 = vpop.eup %317 }
  0xdd   :  { %v130_v24 = vadd.f32 1.0, %v318_v22 }
  0xde   :  { %v320_v23 = vpop.eup %319 }
  0xdf   :  { %v129_v26 = vadd.f32 1.0, %v320_v23  ;;  %v132_v29 = vmul.f32 %v130_v24, %v124_v27 }
  0xe1   :  { %v131_v28 = vmul.f32 %v129_v26, %v123_v25 }
  0xe3   :  { %310 = vmatprep.mubr.msk.f32.mxu1 %vm143_vm1, %v131_v28 }
  0xe4   :  { %311 = vmatmul.mubr.msk.f32.vlgmr.msra.gmra.mxu1 %vm143_vm1, %v132_v29 }
 0x1a4   :  { %v312_v31 = vpop.f32.mrf.mxu1 }
 0x1a5   :  { %v226_v33 = vadd.f32 %v312_v31, %v134_v30 }
 0x1a6   :  { %v216_v34 = vpop.f32.mrf.mxu1 }
 0x1a7   :  { %228 = vst.msk [vmem:[#allocation2 + $0x8] sm:$0xff] %vm25_vm0, %v226_v33  ;;  %v225_v35 = vadd.f32 %v216_v34, %v133_v32 }
 0x1a9   :  { %227 = vst.msk [vmem:[#allocation2] sm:$0xff] %vm25_vm0, %v225_v35 }
 0x1ae   :  { %v233_v37 = vld [vmem:[#allocation2 + $0x8] sm:$0xff] }
 0x1af   :  { %v242_v38 = vadd.f32 %v266_v36, %v233_v37 }
 0x1b0   :  { %v232_v39 = vld [vmem:[#allocation2] sm:$0xff] }
 0x1b1   :  { %v241_v40 = vadd.f32 %v266_v36, %v232_v39  ;;  %244 = vst.msk [vmem:[#allocation3 + $0x8] sm:$0xff] %vm25_vm0, %v242_v38 }
 0x1b3   :  { %243 = vst.msk [vmem:[#allocation3] sm:$0xff] %vm25_vm0, %v241_v40 }
 0x1b4   :  { %332 = shalt.err (!%p329_p4)
}
 0x1b5   :  { %s345_s24 = smov 128   ;;  %s346_s4 = smov 8  }
 0x1b6   :  { %256 = dma.vmem_to_hbm [thread:$0]  %s251_s22, 256, %s441_s5, [#allocation4], %s345_s24, %s345_s24, %s346_s4  }
 0x1b7   :  { %341 = dma.done.wait [#allocation4], 256  }
 0x1b8   :  { %342 = vsyncadd [#allocation4], 4294967040 }
 0x1b9   :  { %260 = vsyncpa [#allocation4], 1 }

</bundles_post_ra>
